<compile_context>
chip_gen: v7x
topology: tpu7x:2x2x1
jax: 0.10.0
libtpu: 0.0.40
codegen_flags: <defaults>
</compile_context>

<pallas_src>
import jax
import jax.numpy as jnp
from jax.experimental import pallas as pl
from jax.experimental.pallas import tpu as pltpu

SMOOTH = 1e-6
_LANE = 512                      # lane-dense row width (multiple of 128)
_BLOCK_BYTES = 4 * 1024 * 1024   # per-input block cap (~4 MiB)


def _ceil_div(a, b):
    return -(-a // b)


def _round_up(a, b):
    return _ceil_div(a, b) * b


def _dice_kernel(x_ref, y_ref, dice_ref, inter_acc, sum_acc):
    # x_ref / y_ref : (1, TILE_R, L) tile of one batch element (native dtype).
    # dice_ref      : (1, 1, 1) per-batch dice score (resident across the tile axis).
    # inter_acc / sum_acc : (8, L) f32 vreg-shaped VMEM accumulators.
    t = pl.program_id(1)
    nt = pl.num_programs(1)

    @pl.when(t == 0)
    def _():
        inter_acc[...] = jnp.zeros_like(inter_acc)
        sum_acc[...] = jnp.zeros_like(sum_acc)

    x = x_ref[0].astype(jnp.float32)  # (TILE_R, L)
    y = y_ref[0].astype(jnp.float32)  # (TILE_R, L)

    L = x.shape[-1]
    # Layout-free reshape: last two dims keep the native (8, 128) f32 tiling, so the
    # axis-0 reduction is a chain of vreg-wise VPU adds (no XLU work per step).
    xr = x.reshape(-1, 8, L)
    yr = y.reshape(-1, 8, L)

    inter_acc[...] += jnp.sum(xr * yr, axis=0)
    sum_acc[...] += jnp.sum(xr + yr, axis=0)  # fused union reduction (one pass over x+y)

    @pl.when(t == nt - 1)
    def _():
        # Single cross-lane/cross-sublane XLU reduce + divide, once per batch element.
        inter = jnp.sum(inter_acc[...])
        union = jnp.sum(sum_acc[...])
        dice = (2.0 * inter + SMOOTH) / (union + SMOOTH)
        dice_ref[...] = jnp.reshape(dice, (1, 1, 1))


def _choose_layout(chw, itemsize_min, itemsize_max):
    """Pick a lane-dense, dtype-aware (rows, L) layout and a balanced row tile."""
    # Sublane granularity: 8 for f32, 16 for bf16/f16, 32 for int8/fp8.
    sublane = max(8, 32 // itemsize_min)
    rows = _ceil_div(chw, _LANE)
    max_rows = max(sublane,
                   (_BLOCK_BYTES // (_LANE * itemsize_max)) // sublane * sublane)
    n_tiles = _ceil_div(rows, max_rows)
    # Balance rows across tiles, round up to the sublane multiple; the remainder is
    # absorbed by zero padding (reduction-safe), so no masked tail tile is needed.
    tile_r = _round_up(_ceil_div(rows, n_tiles), sublane)
    rows_padded = n_tiles * tile_r
    return rows_padded, _LANE, tile_r, n_tiles


def dice_loss(x, y):
    """x, y: (B, C, H, W) arrays. Returns a scalar f32 dice loss."""
    assert x.shape == y.shape and x.ndim == 4
    B, C, H, W = x.shape
    chw = C * H * W
    isx = jnp.dtype(x.dtype).itemsize
    isy = jnp.dtype(y.dtype).itemsize
    rows, L, tile_r, n_tiles = _choose_layout(chw, min(isx, isy), max(isx, isy))

    total = rows * L
    x2 = x.reshape(B, chw)
    y2 = y.reshape(B, chw)
    if total != chw:
        # Zero padding contributes 0 to both the intersection and the union sums.
        x2 = jnp.pad(x2, ((0, 0), (0, total - chw)))
        y2 = jnp.pad(y2, ((0, 0), (0, total - chw)))
    x3 = x2.reshape(B, rows, L)
    y3 = y2.reshape(B, rows, L)

    cost = pl.CostEstimate(
        flops=3 * B * rows * L,          # mul + 2 adds per element pair
        transcendentals=0,
        bytes_accessed=B * rows * L * (isx + isy) + 4 * B,
    )

    # TODO(synk): for v7x with B == 1, split the tile axis 2-way (per-core partial
    # inter/union outputs combined in XLA) so both TensorCores contribute.
    # TODO(synk): if xprof shows exposed DMA gaps on v7x, set pipeline_mode=pl.Buffered(3)
    # on the two input BlockSpecs.
    dice = pl.pallas_call(
        _dice_kernel,
        out_shape=jax.ShapeDtypeStruct((B, 1, 1), jnp.float32),
        grid_spec=pltpu.PrefetchScalarGridSpec(
            num_scalar_prefetch=0,
            grid=(B, n_tiles),
            in_specs=[
                pl.BlockSpec((1, tile_r, L), lambda b, t: (b, t, 0)),
                pl.BlockSpec((1, tile_r, L), lambda b, t: (b, t, 0)),
            ],
            out_specs=pl.BlockSpec((1, 1, 1), lambda b, t: (b, 0, 0)),
            scratch_shapes=[
                pltpu.VMEM((8, L), jnp.float32),  # intersection partial sums
                pltpu.VMEM((8, L), jnp.float32),  # union partial sums
            ],
        ),
        compiler_params=pltpu.CompilerParams(
            # Batch axis is independent (per-batch outputs); tile axis is the reduction.
            dimension_semantics=("parallel", "arbitrary"),
            # 2 inputs x 2 buffers x ~4 MiB = ~16 MiB; give headroom on every generation.
            vmem_limit_bytes=48 * 1024 * 1024,
        ),
        cost_estimate=cost,
    )(x3, y3)

    # Tiny final reduction (B scalars) stays in XLA.
    return 1.0 - jnp.mean(dice[:, 0, 0])


def dice_loss_ref(x, y):
    xf = x.astype(jnp.float32)
    yf = y.astype(jnp.float32)
    inter = jnp.sum(xf * yf, axis=(1, 2, 3))
    union = jnp.sum(xf, axis=(1, 2, 3)) + jnp.sum(yf, axis=(1, 2, 3))
    dice = (2.0 * inter + SMOOTH) / (union + SMOOTH)
    return 1.0 - jnp.mean(dice)


if __name__ == "__main__":
    key = jax.random.PRNGKey(0)
    kx, ky = jax.random.split(key)

    B, C, H, W = 2, 4, 16, 16
    # x: model output (probability-like), y: binary target mask.
    x = jax.random.uniform(kx, (B, C, H, W), dtype=jnp.float32)
    y = (jax.random.uniform(ky, (B, C, H, W), dtype=jnp.float32) > 0.5).astype(jnp.float32)

    loss = dice_loss(x, y)
    jax.block_until_ready(loss)

    ref = dice_loss_ref(x, y)
    assert jnp.allclose(loss, ref, rtol=1e-5, atol=1e-6), (loss, ref)

    print("KERNEL_OK")
</pallas_src>

<mosaic_0001>
module attributes {stable_mosaic.version = 11 : i64} {
  func.func @_dice_kernel(%arg0: i32, %arg1: i32, %arg2: memref<1x8x512xf32, #tpu.memory_space<vmem>>, %arg3: memref<1x8x512xf32, #tpu.memory_space<vmem>>, %arg4: memref<1x1x1xf32, #tpu.memory_space<vmem>>, %arg5: memref<8x512xf32, #tpu.memory_space<vmem>>, %arg6: memref<8x512xf32, #tpu.memory_space<vmem>>) attributes {dimension_semantics = [#tpu.dimension_semantics<parallel>, #tpu.dimension_semantics<arbitrary>], iteration_bounds = array<i64: 2, 1>, scalar_prefetch = 0 : i64, scratch_operands = 2 : i64, tpu.core_type = #tpu.core_type<tc>, window_params = [{transform_indices = @transform_0, window_bounds = array<i64: 1, 8, 512>}, {transform_indices = @transform_1, window_bounds = array<i64: 1, 8, 512>}, {transform_indices = @transform_2, window_bounds = array<i64: 1, 1, 1>}]} {
    %c0_i32 = arith.constant 0 : i32
    %0 = arith.cmpi eq, %arg1, %c0_i32 : i32
    %1 = arith.extui %0 : i1 to i32
    %c0_i32_0 = arith.constant 0 : i32
    %2 = arith.cmpi ne, %1, %c0_i32_0 : i32
    scf.if %2 {
      %cst_17 = arith.constant 0.000000e+00 : f32
      %22 = vector.broadcast %cst_17 : f32 to vector<8x512xf32>
      %c0_18 = arith.constant 0 : index
      %c0_19 = arith.constant 0 : index
      %23 = vector.load %arg5[%c0_18, %c0_19] : memref<8x512xf32, #tpu.memory_space<vmem>>, vector<8x512xf32>
      tpu.vector_store %arg5[%c0_18, %c0_19], %22 {strides = array<i32>} : memref<8x512xf32, #tpu.memory_space<vmem>>, vector<8x512xf32>,
      %cst_20 = arith.constant 0.000000e+00 : f32
      %24 = vector.broadcast %cst_20 : f32 to vector<8x512xf32>
      %c0_21 = arith.constant 0 : index
      %c0_22 = arith.constant 0 : index
      %25 = vector.load %arg6[%c0_21, %c0_22] : memref<8x512xf32, #tpu.memory_space<vmem>>, vector<8x512xf32>
      tpu.vector_store %arg6[%c0_21, %c0_22], %24 {strides = array<i32>} : memref<8x512xf32, #tpu.memory_space<vmem>>, vector<8x512xf32>,
    } else {
    }
    %c0 = arith.constant 0 : index
    %c0_1 = arith.constant 0 : index
    %c0_2 = arith.constant 0 : index
    %3 = vector.load %arg2[%c0, %c0_1, %c0_2] : memref<1x8x512xf32, #tpu.memory_space<vmem>>, vector<1x8x512xf32>
    %4 = vector.shape_cast %3 : vector<1x8x512xf32> to vector<8x512xf32>
    %c0_3 = arith.constant 0 : index
    %c0_4 = arith.constant 0 : index
    %c0_5 = arith.constant 0 : index
    %5 = vector.load %arg3[%c0_3, %c0_4, %c0_5] : memref<1x8x512xf32, #tpu.memory_space<vmem>>, vector<1x8x512xf32>
    %6 = vector.shape_cast %5 : vector<1x8x512xf32> to vector<8x512xf32>
    %7 = vector.shape_cast %4 : vector<8x512xf32> to vector<1x8x512xf32>
    %8 = vector.shape_cast %6 : vector<8x512xf32> to vector<1x8x512xf32>
    %c0_6 = arith.constant 0 : index
    %c0_7 = arith.constant 0 : index
    %9 = vector.load %arg5[%c0_6, %c0_7] : memref<8x512xf32, #tpu.memory_space<vmem>>, vector<8x512xf32>
    %10 = arith.mulf %7, %8 : vector<1x8x512xf32>
    %cst = arith.constant dense<0.000000e+00> : vector<8x512xf32>
    %11 = vector.multi_reduction <add>, %10, %cst [0] : vector<1x8x512xf32> to vector<8x512xf32>
    %12 = arith.addf %9, %11 : vector<8x512xf32>
    %c0_8 = arith.constant 0 : index
    %c0_9 = arith.constant 0 : index
    %13 = vector.load %arg5[%c0_8, %c0_9] : memref<8x512xf32, #tpu.memory_space<vmem>>, vector<8x512xf32>
    tpu.vector_store %arg5[%c0_8, %c0_9], %12 {strides = array<i32>} : memref<8x512xf32, #tpu.memory_space<vmem>>, vector<8x512xf32>,
    %c0_10 = arith.constant 0 : index
    %c0_11 = arith.constant 0 : index
    %14 = vector.load %arg6[%c0_10, %c0_11] : memref<8x512xf32, #tpu.memory_space<vmem>>, vector<8x512xf32>
    %15 = arith.addf %7, %8 : vector<1x8x512xf32>
    %cst_12 = arith.constant dense<0.000000e+00> : vector<8x512xf32>
    %16 = vector.multi_reduction <add>, %15, %cst_12 [0] : vector<1x8x512xf32> to vector<8x512xf32>
    %17 = arith.addf %14, %16 : vector<8x512xf32>
    %c0_13 = arith.constant 0 : index
    %c0_14 = arith.constant 0 : index
    %18 = vector.load %arg6[%c0_13, %c0_14] : memref<8x512xf32, #tpu.memory_space<vmem>>, vector<8x512xf32>
    tpu.vector_store %arg6[%c0_13, %c0_14], %17 {strides = array<i32>} : memref<8x512xf32, #tpu.memory_space<vmem>>, vector<8x512xf32>,
    %c0_i32_15 = arith.constant 0 : i32
    %19 = arith.cmpi eq, %arg1, %c0_i32_15 : i32
    %20 = arith.extui %19 : i1 to i32
    %c0_i32_16 = arith.constant 0 : i32
    %21 = arith.cmpi ne, %20, %c0_i32_16 : i32
    scf.if %21 {
      %c0_17 = arith.constant 0 : index
      %c0_18 = arith.constant 0 : index
      %22 = vector.load %arg5[%c0_17, %c0_18] : memref<8x512xf32, #tpu.memory_space<vmem>>, vector<8x512xf32>
      %23 = vector.shape_cast %22 : vector<8x512xf32> to vector<1x8x512xf32>
      %cst_19 = arith.constant dense<0.000000e+00> : vector<1xf32>
      %24 = vector.multi_reduction <add>, %23, %cst_19 [1, 2] : vector<1x8x512xf32> to vector<1xf32>
      %25 = vector.shape_cast %24 : vector<1xf32> to vector<1x1x1xf32>
      %26 = vector.extract %25[0, 0, 0] : f32 from vector<1x1x1xf32>
      %c0_20 = arith.constant 0 : index
      %c0_21 = arith.constant 0 : index
      %27 = vector.load %arg6[%c0_20, %c0_21] : memref<8x512xf32, #tpu.memory_space<vmem>>, vector<8x512xf32>
      %28 = vector.shape_cast %27 : vector<8x512xf32> to vector<1x8x512xf32>
      %cst_22 = arith.constant dense<0.000000e+00> : vector<1xf32>
      %29 = vector.multi_reduction <add>, %28, %cst_22 [1, 2] : vector<1x8x512xf32> to vector<1xf32>
      %30 = vector.shape_cast %29 : vector<1xf32> to vector<1x1x1xf32>
      %31 = vector.extract %30[0, 0, 0] : f32 from vector<1x1x1xf32>
      %cst_23 = arith.constant 2.000000e+00 : f32
      %32 = arith.mulf %cst_23, %26 : f32
      %cst_24 = arith.constant 9.99999997E-7 : f32
      %33 = arith.addf %32, %cst_24 : f32
      %cst_25 = arith.constant 9.99999997E-7 : f32
      %34 = arith.addf %31, %cst_25 : f32
      %35 = arith.divf %33, %34 : f32
      %36 = vector.broadcast %35 : f32 to vector<1x1x1xf32>
      %c0_26 = arith.constant 0 : index
      %c0_27 = arith.constant 0 : index
      %c0_28 = arith.constant 0 : index
      %37 = vector.load %arg4[%c0_26, %c0_27, %c0_28] : memref<1x1x1xf32, #tpu.memory_space<vmem>>, vector<1x1x1xf32>
      tpu.vector_store %arg4[%c0_26, %c0_27, %c0_28], %36 {strides = array<i32>} : memref<1x1x1xf32, #tpu.memory_space<vmem>>, vector<1x1x1xf32>,
    } else {
    }
    return
  }
  func.func @transform_0(%arg0: i32, %arg1: i32) -> (i32, i32, i32) {
    %c0_i32 = arith.constant 0 : i32
    %c0_i32_0 = arith.constant 0 : i32
    return %arg0, %arg1, %c0_i32 : i32, i32, i32
  }
  func.func @transform_1(%arg0: i32, %arg1: i32) -> (i32, i32, i32) {
    %c0_i32 = arith.constant 0 : i32
    %c0_i32_0 = arith.constant 0 : i32
    return %arg0, %arg1, %c0_i32 : i32, i32, i32
  }
  func.func @transform_2(%arg0: i32, %arg1: i32) -> (i32, i32, i32) {
    %c0_i32 = arith.constant 0 : i32
    %c0_i32_0 = arith.constant 0 : i32
    %c0_i32_1 = arith.constant 0 : i32
    return %arg0, %c0_i32, %c0_i32_0 : i32, i32, i32
  }
}

</mosaic_0001>

<bundles_post_ra>
// kernel: tpu_custom_call.1
= control target key start
LH: loop header
LB: loop body
LE: loop exit
PB: predicated region body
PF: predicated region fallthrough
CT: control target
= control target key end

     0   :  { %7 = vsyncpa [#allocation5], 0  ;;  %s807_s0 = inlined_call_operand.hbm [shape: f32[2,8,512], index: 0, kind: input, shape index: {}]   ;;  %s808_s1 = inlined_call_operand.hbm [shape: f32[2,8,512], index: 1, kind: input, shape index: {}]   ;;  %s809_s2 = inlined_call_operand.vmem [shape: f32[2,1,1], index: 2, kind: output, shape index: {}]  }
   0x1   :  { %9 = vsyncpa [#allocation5 + $0x1], 0 }
   0x2   :  { %10 = vsyncpa [#allocation7], 0 }
   0x3   :  { %12 = vsyncpa [#allocation7 + $0x1], 0  ;;  %s635_s9 = smov 0   ;;  %s637_s10 = smov 0  }
   0x4   :  { %s639_s11 = smov 0   ;;  %s641_s12 = smov 0  }
   0x5   :  { %s643_s13 = smov 0   ;;  %s645_s14 = smov 0  }
   0x6 LB: > { %s417_s15 = sadd.s32 4294967295, %s616_s14   ;;  %s30_s16 = sadd.s32 1, %s612_s13  ;;  %s616_s14 = sphi %s645_s14, %s18_s14   ;;  %s612_s13 = sphi %s643_s13, %s823_s13   ;;  %s608_s12 = sphi %s641_s12, %s822_s12   ;;  %s604_s11 = sphi %s639_s11, %s821_s11   ;;  %s600_s10 = sphi %s637_s10, %s820_s10   ;;  %s596_s9 = sphi %s635_s9, %s819_s9  }
   0x7   : > { %p32_p0 = scmp.ge.s32.totalorder %s30_s16, 2  ;;  %s39_s17 = sadd.s32 1, %s604_s11 }
   0x8   : > { %p46_p1 = scmp.ne.s32.totalorder %s604_s11, %s600_s10  ;;  %p47_p2 = scmp.eq.s32.totalorder %s616_s14, 0 }
   0x9   : > { %s825_s16 = smov (%p32_p0, %s30_s16), 0  ;;  %p52_p4 = scmp.ne.s32.totalorder %s600_s10, %s596_s9 }
   0xa   : > { %p671_p3 = por %p47_p2, %p46_p1  ;;  %s34_s19 = ssub.s32 %s612_s13, %s825_s16 }
   0xb   : > { %p53_p5 = scmp.eq.s32.totalorder %s417_s15, 0  ;;  %p37_p6 = scmp.eq.s32.totalorder %s34_s19, 0 }
   0xc   : > { %p451_p8 = scmp.lt.s32.totalorder %s616_s14, 2  ;;  %s687_s22 = sand.u32 1, %s604_s11  }
   0xd   : > { %p678_p7 = por %p53_p5, %p52_p4  ;;  %s432_s23 = sshll.u32 %s612_s13, 9 }
   0xe   : > { %s684_s21 = scalar_select %p37_p6, %s604_s11, %s39_s17  }
   0xf   : > { %s812_s20 = scalar_select %p678_p7, 1, 0 }
  0x10   : > { %s421_s24 = sshll.u32 %s687_s22, 5  ;;  %s696_s27 = scalar_lea.hbm %s807_s0, %s432_s23 }
  0x11   : > { %s134_s28 = scalar_lea.vmem [#allocation4], %s421_s24  ;;  %p702_p9 = pnand %p451_p8, %p671_p3 }
  0x12   : > { %s144_s29 = sshll.u32 %s134_s28, 4  ;;  %s131_s3 = scalar_lea.sflag [#allocation5], %s687_s22  ;;  %s706_s29 = int_to_ptr.vmem [resolvable:$true] %s144_s29 }
  0x13   : > { %s502_s4 = scalar_lea.hbm %s696_s27, 512  ;;  %p504_p13 = pneg %p702_p9 }
  0x14   : > { %p503_p12 = scmp.ne.s32.totalorder %s696_s27, %s502_s4  ;;  %s507_s7 = scalar_lea.hbm %s807_s0, 1024 }
  0x15   : > { %p508_p2 = scmp.lt.u32.totalorder %s696_s27, %s807_s0  ;;  %p509_p3 = scmp.lt.u32.totalorder %s507_s7, %s502_s4 }
  0x16   : > { %p505_p0 = pnand %p504_p13, %p503_p12  ;;  %p511_p5 = scmp.lt.u32.totalorder %s502_s4, %s696_s27 }
  0x17   : > { %p510_p4 = por %p509_p3, %p508_p2 }
  0x18   : > { %p506_p1 = pneg %p505_p0 }
  0x19   : > { %p512_p6 = por %p511_p5, %p510_p4 }
  0x1b   : > { %p513_p8 = pnand %p512_p6, %p506_p1 }
  0x1d   : > { %516 = shalt.err (!%p513_p8)
}
  0x1e   : > { %s517_s15 = scalar_lea.vmem %s706_s29, 512  ;;  %s618_s17 = smov [#allocation4]  }
  0x1f   : > { %p518_p12 = scmp.ne.s32.totalorder %s706_s29, %s517_s15  ;;  %s522_s18 = sshll.u32 %s618_s17, 4  ;;  %s523_s18 = int_to_ptr.vmem [resolvable:$false] %s522_s18 }
  0x20   : > { %s524_s19 = scalar_lea.vmem %s523_s18, 1024  ;;  %p525_p11 = scmp.lt.s32.totalorder %s706_s29, %s523_s18 }
  0x21   : > { %p520_p0 = pnand %p518_p12, %p504_p13  ;;  %p526_p2 = scmp.lt.s32.totalorder %s524_s19, %s517_s15 }
  0x23   : > { %p521_p10 = pneg %p520_p0  ;;  %p527_p3 = por %p526_p2, %p525_p11 }
  0x25   : > { %p528_p4 = pnand %p527_p3, %p521_p10 }
  0x27   : > { %531 = shalt.err (!%p528_p4)
}
  0x28   : > { %447 = dma.hbm_to_vmem [thread:$0]  (!%p702_p9), %s696_s27, 512, %s706_s29, %s131_s3  }
  0x29   : > { %p814_p1 = scmp.lt.s32.totalorder %s616_s14, 3  ;;  %p815_p5 = scmp.ge.s32.totalorder %s616_s14, 1 }
  0x2a   : > { %s749_s4 = scalar_lea.hbm %s808_s1, %s432_s23  ;;  %s155_s5 = scalar_lea.vmem [#allocation6], %s421_s24 }
  0x2b   : > { %p740_p6 = pnand %p815_p5, %p814_p1  ;;  %s165_s6 = sshll.u32 %s155_s5, 4  ;;  %s166_s6 = int_to_ptr.vmem [resolvable:$true] %s165_s6 }
  0x2c   : > { %s152_s27 = scalar_lea.sflag [#allocation7], %s687_s22  ;;  %s532_s29 = scalar_lea.hbm %s749_s4, 512 }
  0x2d   : > { %s816_s25 = scalar_select %p740_p6, 1, 0 }
  0x2e   : > { %p533_p10 = scmp.ne.s32.totalorder %s749_s4, %s532_s29  ;;  %s537_s23 = scalar_lea.hbm %s808_s1, 1024 }
  0x2f   : > { %p538_p12 = scmp.lt.u32.totalorder %s749_s4, %s808_s1  ;;  %p539_p0 = scmp.lt.u32.totalorder %s537_s23, %s532_s29 }
  0x30   : > { %p535_p11 = pnand %p533_p10, %p504_p13  ;;  %p541_p3 = scmp.lt.u32.totalorder %s532_s29, %s749_s4 }
  0x31   : > { %p540_p2 = por %p539_p0, %p538_p12 }
  0x32   : > { %p536_p8 = pneg %p535_p11 }
  0x33   : > { %p542_p4 = por %p541_p3, %p540_p2 }
  0x35   : > { %p543_p1 = pnand %p542_p4, %p536_p8 }
  0x37   : > { %546 = shalt.err (!%p543_p1)
}
  0x38   : > { %s547_s22 = scalar_lea.vmem %s166_s6, 512  ;;  %s619_s24 = smov [#allocation6]  }
  0x39   : > { %p548_p5 = scmp.ne.s32.totalorder %s166_s6, %s547_s22  ;;  %s552_s15 = sshll.u32 %s619_s24, 4  ;;  %s553_s15 = int_to_ptr.vmem [resolvable:$false] %s552_s15 }
  0x3a   : > { %s554_s17 = scalar_lea.vmem %s553_s15, 1024  ;;  %p555_p7 = scmp.lt.s32.totalorder %s166_s6, %s553_s15 }
  0x3b   : > { %p550_p10 = pnand %p548_p5, %p504_p13  ;;  %p556_p6 = scmp.lt.s32.totalorder %s554_s17, %s547_s22 }
  0x3d   : > { %p551_p11 = pneg %p550_p10  ;;  %p557_p0 = por %p556_p6, %p555_p7 }
  0x3f   : > { %p558_p12 = pnand %p557_p0, %p551_p11 }
  0x41   : > { %561 = shalt.err (!%p558_p12)
}
  0x42   : > { %450 = dma.hbm_to_vmem [thread:$0]  (!%p702_p9), %s749_s4, 512, %s166_s6, %s152_s27  }
  0x43   : > { %p817_p8 = scmp.ne.s32.totalorder %s816_s25, 0 }
  0x44   : > { %s176_s18 = sand.u32 (!%p817_p8), 1, %s600_s10   ;;  %p818_p13 = scmp.ne.s32.totalorder (!%p817_p8), %s812_s20, 0 }
  0x45   : > { %174 = sbr.rel (%p817_p8) target bundleno = 366 (0x16e), region = 28  ;;  %s428_s19 = sshll.u32 (!%p817_p8), %s176_s18, 5 }
  0x46   : > { %s177_s26 = scalar_lea.sflag (!%p817_p8), [#allocation5], %s176_s18  ;;  %s180_s28 = scalar_lea.vmem (!%p817_p8), [#allocation4], %s428_s19 }
  0x4c   : > { %587 = dma.done.wait (%p818_p13), %s177_s26, 512  }
  0x4d   : > { %589 = vsyncadd (%p818_p13), %s177_s26, 4294966784  ;;  %s186_s5 = scalar_lea.sflag [#allocation7], %s176_s18  ;;  %s189_s29 = scalar_lea.vmem [#allocation6], %s428_s19 }
  0x4e   : > { %591 = dma.done.wait (%p818_p13), %s186_s5, 512  }
  0x4f   : > { %593 = vsyncadd (%p818_p13), %s186_s5, 4294966784  ;;  %v228_v0 = vld [vmem:[%s180_s28] sm:$0xff]  ;;  %v229_v1 = vld [vmem:[%s180_s28 + $0x8] sm:$0xff]  ;;  %p213_p7 = scmp.lt.s32.totalorder %s608_s12, 1  ;;  %vm319_vm0 = vcmask 0  }
  0x50   : > { %v230_v2 = vld [vmem:[%s180_s28 + $0x10] sm:$0xff]  ;;  %v231_v3 = vld [vmem:[%s180_s28 + $0x18] sm:$0xff]  ;;  %v232_v4 = vld [vmem:[%s189_s29] sm:$0xff] }
  0x51   : > { %v233_v5 = vld [vmem:[%s189_s29 + $0x8] sm:$0xff]  ;;  %v234_v6 = vld [vmem:[%s189_s29 + $0x10] sm:$0xff]  ;;  %v235_v7 = vld [vmem:[%s189_s29 + $0x18] sm:$0xff]  ;;  %v240_v8 = vmul.f32 %v232_v4, %v228_v0  ;;  %v260_v10 = vadd.f32 %v232_v4, %v228_v0  ;;  %s827_s12 = smov (!%p213_p7, %s608_s12), 1 }
  0x52   : > { %v241_v9 = vmul.f32 %v233_v5, %v229_v1  ;;  %v261_v11 = vadd.f32 %v233_v5, %v229_v1  ;;  %v242_v12 = vmul.f32 %v234_v6, %v230_v2  ;;  %v262_v13 = vadd.f32 %v234_v6, %v230_v2  ;;  %s215_s23 = scalar_lea.vmem %s809_s2, %s827_s12 }
  0x53   : > { %v243_v14 = vmul.f32 %v235_v7, %v231_v3  ;;  %v263_v18 = vadd.f32 %v235_v7, %v231_v3 }
  0x54   : > { %v283_v15 = vadd.f32 %v241_v9, %v240_v8  ;;  %v299_v16 = vadd.f32 %v261_v11, %v260_v10 }
  0x56   : > { %v284_v17 = vadd.f32 %v283_v15, %v242_v12  ;;  %v300_v19 = vadd.f32 %v299_v16, %v262_v13 }
  0x58   : > { %v285_v20 = vadd.f32 %v284_v17, %v243_v14  ;;  %v301_v21 = vadd.f32 %v300_v19, %v263_v18 }
  0x5a   : > { %286 = vadd.xlane.f32.xlu0 %v285_v20 }
  0x5e   : > { %302 = vadd.xlane.f32.xlu0 %v301_v21 }
  0xe7   : > { %v287_v22 = vpop.xlane.xlu0 %286 }
  0xe8   : > { %v288_v23 = vrot.slane %v287_v22, 4 }
  0xea   : > { %v289_v24 = vadd.f32 %v288_v23, %v287_v22 }
  0xeb   : > { %v303_v25 = vpop.xlane.xlu0 %302 }
  0xec   : > { %v290_v26 = vrot.slane %v289_v24, 2  ;;  %v304_v27 = vrot.slane %v303_v25, 4 }
  0xee   : > { %v305_v28 = vadd.f32 %v304_v27, %v303_v25  ;;  %v291_v29 = vadd.f32 %v290_v26, %v289_v24 }
  0xf0   : > { %v306_v30 = vrot.slane %v305_v28, 2  ;;  %v292_v31 = vrot.slane %v291_v29, 1 }
  0xf2   : > { %v307_v32 = vadd.f32 %v306_v30, %v305_v28  ;;  %v293_v33 = vadd.f32 %v292_v31, %v291_v29 }
  0xf4   : > { %434 = vpush %v293_v33  ;;  %v308_v34 = vrot.slane %v307_v32, 1 }
  0xf6   : > { %v309_v35 = vadd.f32 %v308_v34, %v307_v32 }
  0xf8   : > { %436 = vpush %v309_v35 }
 0x125   : > { %s435_s20 = spop %434 }
 0x126   : > { %s311_s4 = smul.f32 2.0, %s435_s20 }
 0x128   : > { %s312_s6 = sadd.f32 1e-06, %s311_s4 }
 0x129   : > { %s437_s30 = spop %436 }
 0x12a   : > { %s313_s25 = sadd.f32 1e-06, %s437_s30 }
 0x12c   : > { %v314_v36 = vstv %s313_s25 }
 0x12d   : > { %500 = vrcp.f32 %v314_v36 }
 0x137   : > { %v501_v37 = vpop.eup %500 }
 0x138   : > { %438 = vpush %v501_v37 }
 0x169   : > { %s439_s27 = spop %438 }
 0x16a   : > { %s317_s8 = smul.f32 %s439_s27, %s312_s6 }
 0x16c   : > { %v318_v38 = vstv %s317_s8 }
 0x16d   : > { %320 = vst.msk [vmem:[%s215_s23] sm:$0x1] %vm319_vm0, %v318_v38 }
 0x16e PF: > { %s18_s14 = sadd.s32 1, %s616_s14   ;;  %s819_s9 = smov %s600_s10 }
 0x16f   : > { %p15_p9 = scmp.ge.s32.totalorder %s18_s14, 4   ;;  %s820_s10 = smov %s604_s11 }
 0x170   : > { %s821_s11 = smov %s684_s21  ;;  %s822_s12 = smov %s612_s13 }
 0x171   : > { %s823_s13 = smov %s825_s16  ;;  %17 = sbr.rel (!%p15_p9) target bundleno = 6 (0x6), region = 89 }
 0x178   :  { %338 = vsyncpa [#allocation5], 1 }
 0x179   :  { %340 = vsyncpa [#allocation5 + $0x1], 1 }
 0x17a   :  { %341 = vsyncpa [#allocation7], 1 }
 0x17b   :  { %343 = vsyncpa [#allocation7 + $0x1], 1 }

</bundles_post_ra>
